<compile_context>
chip_gen: v7x
topology: tpu7x:2x2x1
jax: 0.10.0
libtpu: 0.0.40
codegen_flags: <defaults>
</compile_context>

<pallas_src>
import jax
import jax.numpy as jnp
from jax.experimental import pallas as pl
from jax.experimental.pallas import tpu as pltpu


def _patch_embed_kernel(p_ref, w_ref, b_ref, pos_ref, o_ref):
    """One (batch, patch-tile) grid step.

    p_ref  : (1, TN, K)  bf16   flattened patches (im2col)
    w_ref  : (K, D)      bf16   conv weight, reshaped + pre-transposed (y = p @ W)
    b_ref  : (1, D)      f32    conv bias
    pos_ref: (1, TN, D)  f32    position-embedding slice for this patch tile
    o_ref  : (1, TN, D)  f32
    """
    acc = jnp.dot(p_ref[0], w_ref[...], preferred_element_type=jnp.float32)
    o_ref[0] = (acc + b_ref[...] + pos_ref[0]).astype(o_ref.dtype)


def _pick_tile_n(n, cap=256):
    """Largest multiple-of-16 divisor of n that is <= cap (bf16 sublane packing),
    falling back to the full extent (always legal as a block dim)."""
    if n <= cap:
        return n
    for t in range(cap - cap % 16, 15, -16):
        if n % t == 0:
            return t
    return n


def embedding_layer(x, params, *, patch_size, is_cls_token=False, tile_n=None):
    """x: (B, 3, H, W) float32.  Returns (B, num_patches(+1), dim) float32."""
    conv_w, conv_b, pos_emb, cls_token = params
    B, C, H, W = x.shape
    P = patch_size
    Hp, Wp = H // P, W // P
    N = Hp * Wp
    D = conv_w.shape[0]
    K = C * P * P

    # --- im2col (layout plumbing, done once outside the kernel) -------------
    #   (B, C, Hp, P, Wp, P) -> (B, Hp, Wp, C, P, P) -> (B, N, K)
    # Patch-feature order (c, ph, pw) matches conv_w.reshape(D, K).
    patches = (x.reshape(B, C, Hp, P, Wp, P)
                 .transpose(0, 2, 4, 1, 3, 5)
                 .reshape(B, N, K)).astype(jnp.bfloat16)
    w = conv_w.reshape(D, K).T.astype(jnp.bfloat16)            # (K, D)
    bias = conv_b.reshape(1, D).astype(jnp.float32)
    pos_patches = (pos_emb[:, 1:, :] if is_cls_token else pos_emb).astype(jnp.float32)

    if tile_n is None:
        tile_n = _pick_tile_n(N)
    assert N % tile_n == 0 and (tile_n == N or tile_n % 16 == 0), (N, tile_n)

    grid = (B, N // tile_n)

    out_patches = pl.pallas_call(
        _patch_embed_kernel,
        out_shape=jax.ShapeDtypeStruct((B, N, D), jnp.float32),
        grid_spec=pltpu.PrefetchScalarGridSpec(
            num_scalar_prefetch=0,
            grid=grid,
            in_specs=[
                pl.BlockSpec((1, tile_n, K), lambda b, n: (b, n, 0)),   # patches
                pl.BlockSpec((K, D), lambda b, n: (0, 0)),              # weight (const)
                pl.BlockSpec((1, D), lambda b, n: (0, 0)),              # bias   (const)
                pl.BlockSpec((1, tile_n, D), lambda b, n: (0, n, 0)),   # pos emb
            ],
            out_specs=pl.BlockSpec((1, tile_n, D), lambda b, n: (b, n, 0)),
        ),
        compiler_params=pltpu.CompilerParams(
            dimension_semantics=("parallel", "parallel")),
    )(patches, w, bias, pos_patches)

    if is_cls_token:
        # cls-token row is a single (1, D) broadcast-add; done in the wrapper.
        cls_row = (cls_token[:, 0, :] + pos_emb[:, 0, :]).astype(jnp.float32)  # (1, D)
        cls_rows = jnp.broadcast_to(cls_row[:, None, :], (B, 1, D))
        return jnp.concatenate([cls_rows, out_patches], axis=1)
    return out_patches


def make_params(key, *, dim, patch_size, image_size, is_cls_token=False):
    """Mirror the PyTorch module's parameter shapes / init."""
    num_patches = (image_size // patch_size) ** 2
    fan_in = 3 * patch_size * patch_size
    k_w, k_b, k_pos = jax.random.split(key, 3)
    bound = 1.0 / (fan_in ** 0.5)     # torch Conv2d default (kaiming-uniform, a=sqrt(5))
    conv_w = jax.random.uniform(k_w, (dim, 3, patch_size, patch_size),
                                jnp.float32, -bound, bound)
    conv_b = jax.random.uniform(k_b, (dim,), jnp.float32, -bound, bound)
    n_pos = num_patches + 1 if is_cls_token else num_patches
    pos_emb = 0.02 * jax.random.normal(k_pos, (1, n_pos, dim), jnp.float32)
    cls_token = jnp.zeros((1, 1, dim), jnp.float32) if is_cls_token else None
    return conv_w, conv_b, pos_emb, cls_token


def reference_embedding(x, params, *, patch_size, is_cls_token=False):
    """Pure-JAX replica of the PyTorch forward (eval mode), f32 conv."""
    conv_w, conv_b, pos_emb, cls_token = params
    B = x.shape[0]
    D = conv_w.shape[0]
    y = jax.lax.conv_general_dilated(
        x, conv_w, window_strides=(patch_size, patch_size), padding="VALID",
        dimension_numbers=("NCHW", "OIHW", "NCHW"),
        precision=jax.lax.Precision.HIGHEST)
    y = y + conv_b.reshape(1, D, 1, 1)
    _, _, Hp, Wp = y.shape
    y = y.transpose(0, 2, 3, 1).reshape(B, Hp * Wp, D)
    if is_cls_token:
        cls = jnp.broadcast_to(cls_token, (B, 1, D))
        y = jnp.concatenate([cls, y], axis=1)
    return y + pos_emb            # dropout = identity (eval mode)


if __name__ == "__main__":
    BATCH, DIM, IMG = 2, 32, 16
    key = jax.random.PRNGKey(0)
    k_x, k_p = jax.random.split(key)
    x = jax.random.normal(k_x, (BATCH, 3, IMG, IMG), jnp.float32)

    # (patch_size, is_cls_token, explicit tile_n)
    configs = [
        (4, False, None),   # num_patches = 16, single N-tile
        (2, True, 16),      # num_patches = 64, grid = (2, 4): multi-tile pipeline
    ]
    for patch, is_cls, tile_n in configs:
        params = make_params(k_p, dim=DIM, patch_size=patch, image_size=IMG,
                             is_cls_token=is_cls)
        out = embedding_layer(x, params, patch_size=patch,
                              is_cls_token=is_cls, tile_n=tile_n)
        out = jax.block_until_ready(out)

        ref = reference_embedding(x, params, patch_size=patch, is_cls_token=is_cls)
        n_tok = (IMG // patch) ** 2 + (1 if is_cls else 0)
        assert out.shape == (BATCH, n_tok, DIM), out.shape
        # Kernel matmul uses bf16 operands (f32 accumulation); compare vs f32 ref.
        err = float(jnp.max(jnp.abs(out - ref)))
        assert jnp.allclose(out, ref, atol=3e-2, rtol=3e-2), err

    print("KERNEL_OK")
</pallas_src>

<mosaic_0001>
module attributes {stable_mosaic.version = 11 : i64} {
  func.func @_patch_embed_kernel(%arg0: i32, %arg1: i32, %arg2: memref<1x16x48xbf16, #tpu.memory_space<vmem>>, %arg3: memref<48x32xbf16, #tpu.memory_space<vmem>>, %arg4: memref<1x32xf32, #tpu.memory_space<vmem>>, %arg5: memref<1x16x32xf32, #tpu.memory_space<vmem>>, %arg6: memref<1x16x32xf32, #tpu.memory_space<vmem>>) attributes {dimension_semantics = [#tpu.dimension_semantics<parallel>, #tpu.dimension_semantics<parallel>], iteration_bounds = array<i64: 2, 1>, scalar_prefetch = 0 : i64, scratch_operands = 0 : i64, tpu.core_type = #tpu.core_type<tc>, window_params = [{transform_indices = @transform_0, window_bounds = array<i64: 1, 16, 48>}, {pipeline_mode = #tpu.pipeline_mode<synchronous>, transform_indices = @transform_1, window_bounds = array<i64: 48, 32>}, {pipeline_mode = #tpu.pipeline_mode<synchronous>, transform_indices = @transform_2, window_bounds = array<i64: 1, 32>}, {transform_indices = @transform_3, window_bounds = array<i64: 1, 16, 32>}, {transform_indices = @transform_4, window_bounds = array<i64: 1, 16, 32>}]} {
    %c0 = arith.constant 0 : index
    %c0_0 = arith.constant 0 : index
    %c0_1 = arith.constant 0 : index
    %0 = vector.load %arg2[%c0, %c0_0, %c0_1] : memref<1x16x48xbf16, #tpu.memory_space<vmem>>, vector<1x16x48xbf16>
    %1 = vector.shape_cast %0 : vector<1x16x48xbf16> to vector<16x48xbf16>
    %c0_2 = arith.constant 0 : index
    %c0_3 = arith.constant 0 : index
    %2 = vector.load %arg3[%c0_2, %c0_3] : memref<48x32xbf16, #tpu.memory_space<vmem>>, vector<48x32xbf16>
    %cst = arith.constant dense<0.000000e+00> : vector<16x32xf32>
    %3 = tpu.matmul %1, %2, %cst {dimension_numbers = #tpu.dot_dimension_numbers<[1], [0], [0], [1], [0, 0, 1, 1], [], []>} : vector<16x48xbf16>, vector<48x32xbf16>, vector<16x32xf32> -> vector<16x32xf32>
    %c0_4 = arith.constant 0 : index
    %c0_5 = arith.constant 0 : index
    %4 = vector.load %arg4[%c0_4, %c0_5] : memref<1x32xf32, #tpu.memory_space<vmem>>, vector<1x32xf32>
    %5 = vector.broadcast %4 : vector<1x32xf32> to vector<16x32xf32>
    %6 = arith.addf %3, %5 : vector<16x32xf32>
    %c0_6 = arith.constant 0 : index
    %c0_7 = arith.constant 0 : index
    %c0_8 = arith.constant 0 : index
    %7 = vector.load %arg5[%c0_6, %c0_7, %c0_8] : memref<1x16x32xf32, #tpu.memory_space<vmem>>, vector<1x16x32xf32>
    %8 = vector.shape_cast %7 : vector<1x16x32xf32> to vector<16x32xf32>
    %9 = arith.addf %6, %8 : vector<16x32xf32>
    %c0_9 = arith.constant 0 : index
    %c0_10 = arith.constant 0 : index
    %c0_11 = arith.constant 0 : index
    %10 = vector.load %arg6[%c0_9, %c0_10, %c0_11] : memref<1x16x32xf32, #tpu.memory_space<vmem>>, vector<1x16x32xf32>
    %11 = vector.shape_cast %10 : vector<1x16x32xf32> to vector<16x32xf32>
    %12 = vector.shape_cast %9 : vector<16x32xf32> to vector<1x16x32xf32>
    tpu.vector_store %arg6[%c0_9, %c0_10, %c0_11], %12 {strides = array<i32>} : memref<1x16x32xf32, #tpu.memory_space<vmem>>, vector<1x16x32xf32>,
    return
  }
  func.func @transform_0(%arg0: i32, %arg1: i32) -> (i32, i32, i32) {
    %c0_i32 = arith.constant 0 : i32
    %c0_i32_0 = arith.constant 0 : i32
    return %arg0, %arg1, %c0_i32 : i32, i32, i32
  }
  func.func @transform_1(%arg0: i32, %arg1: i32) -> (i32, i32) {
    %c0_i32 = arith.constant 0 : i32
    %c0_i32_0 = arith.constant 0 : i32
    %c0_i32_1 = arith.constant 0 : i32
    return %c0_i32, %c0_i32_0 : i32, i32
  }
  func.func @transform_2(%arg0: i32, %arg1: i32) -> (i32, i32) {
    %c0_i32 = arith.constant 0 : i32
    %c0_i32_0 = arith.constant 0 : i32
    %c0_i32_1 = arith.constant 0 : i32
    return %c0_i32, %c0_i32_0 : i32, i32
  }
  func.func @transform_3(%arg0: i32, %arg1: i32) -> (i32, i32, i32) {
    %c0_i32 = arith.constant 0 : i32
    %c0_i32_0 = arith.constant 0 : i32
    %c0_i32_1 = arith.constant 0 : i32
    return %c0_i32, %arg1, %c0_i32_0 : i32, i32, i32
  }
  func.func @transform_4(%arg0: i32, %arg1: i32) -> (i32, i32, i32) {
    %c0_i32 = arith.constant 0 : i32
    %c0_i32_0 = arith.constant 0 : i32
    return %arg0, %arg1, %c0_i32 : i32, i32, i32
  }
}

</mosaic_0001>

<bundles_post_ra>
// kernel: tpu_custom_call.1
= control target key start
LH: loop header
LB: loop body
LE: loop exit
PB: predicated region body
PF: predicated region fallthrough
CT: control target
= control target key end

     0   :  { %9 = vsyncpa [#allocation3], 0  ;;  %s792_s0 = inlined_call_operand.vmem [shape: bf16[2,16,48], index: 0, kind: input, shape index: {}]   ;;  %s793_s1 = inlined_call_operand.vmem [shape: bf16[48,32], index: 1, kind: input, shape index: {}]   ;;  %s794_s2 = inlined_call_operand.vmem [shape: f32[1,32], index: 2, kind: input, shape index: {}]   ;;  %s795_s3 = inlined_call_operand.vmem [shape: f32[1,16,32], index: 3, kind: input, shape index: {}]   ;;  %s796_s4 = inlined_call_operand.hbm [shape: f32[2,16,32], index: 4, kind: output, shape index: {}]  }
   0x1   :  { %11 = vsyncpa [#allocation3 + $0x1], 0  ;;  %s659_s15 = smov 0   ;;  %s661_s16 = smov 0  }
   0x2   :  { %s663_s17 = smov 0   ;;  %s665_s18 = smov 0  }
   0x3   :  { %s667_s19 = smov 0   ;;  %s669_s20 = smov 0  }
   0x4 LB: > { %s450_s21 = sadd.s32 4294967295, %s627_s20   ;;  %s451_s22 = sadd.s32 4294967294, %s627_s20   ;;  %s627_s20 = sphi %s669_s20, %s17_s20   ;;  %s623_s19 = sphi %s667_s19, %s803_s19   ;;  %s619_s18 = sphi %s665_s18, %s802_s18   ;;  %s615_s17 = sphi %s663_s17, %s801_s17   ;;  %s611_s16 = sphi %s661_s16, %s800_s16   ;;  %s607_s15 = sphi %s659_s15, %s799_s15  }
   0x5   : > { %s29_s23 = sadd.s32 1, %s623_s19  ;;  %s134_s24 = sadd.s32 1, %s615_s17 }
   0x6   : > { %p31_p0 = scmp.ge.s32.totalorder %s29_s23, 2  ;;  %p144_p1 = scmp.ne.s32.totalorder %s615_s17, %s611_s16 }
   0x7   : > { %p145_p2 = scmp.eq.s32.totalorder %s450_s21, 1  ;;  %p150_p3 = scmp.ne.s32.totalorder %s611_s16, %s607_s15 }
   0x8   : > { %s805_s23 = smov (%p31_p0, %s29_s23), 0  ;;  %p151_p5 = scmp.eq.s32.totalorder %s451_s22, 1 }
   0x9   : > { %p699_p4 = por %p145_p2, %p144_p1  ;;  %s129_s26 = ssub.s32 %s623_s19, %s805_s23 }
   0xa   : > { %p455_p6 = scmp.ge.s32.totalorder %s627_s20, 1  ;;  %p132_p7 = scmp.eq.s32.totalorder %s129_s26, 0 }
   0xb   : > { %p706_p8 = por %p151_p5, %p150_p3  ;;  %p197_p9 = scmp.lt.s32.totalorder %s627_s20, 3 }
   0xc   : > { %s712_s28 = scalar_select %p132_p7, %s615_s17, %s134_s24  }
   0xd   : > { %p198_p10 = pnand %p455_p6, %p197_p9 }
   0xe   : > { %v545_v0 = vld [vmem:[%s793_s1] sm:$0xff] (!%p198_p10)   ;;  %v629_v1 = vmov (!%p198_p10), 0.0   ;;  %v546_v2 = vld [vmem:[%s793_s1 + $0x8] sm:$0xff] (!%p198_p10)   ;;  %vm630_vm0 = vmmov (!%p198_p10), 0   ;;  %p233_p11 = scmp.lt.s32.totalorder (!%p198_p10), %s619_s18, 1  ;;  %v547_v3 = vld [vmem:[%s793_s1 + $0x10] sm:$0xff] (!%p198_p10)  }
   0xf   : > { %201 = sbr.rel (%p198_p10) target bundleno = 260 (0x104), region = 36  ;;  %476 = vmatprep.subr.bf16.mxu0 (!%p198_p10), %v629_v1  ;;  %482 = vmatprep.mubr.msk.bf16.mxu0 (!%p198_p10), %vm630_vm0, %v629_v1  ;;  %vm288_vm1 = vcmask (!%p198_p10), 392192   ;;  %s229_s14 = sand.u32 (!%p198_p10), 1, %s611_s16   ;;  %v459_v5 = vld [vmem:[%s794_s2] ss:$0 sm:$0xff] (!%p198_p10)  ;;  %vm337_vm2 = vcmask (!%p198_p10), 261120  }
  0x10   : > { %477 = vmatpush3.bf16.msra.mxu0 (!%p198_p10), %v545_v0  ;;  %s456_s21 = sshll.u32 (!%p198_p10), %s229_s14, 4  ;;  %v333_v7 = vld [vmem:[%s795_s3] sm:$0xff] (!%p198_p10)  ;;  %s471_s6 = sshll.u32 (!%p198_p10), %s619_s18, 8  ;;  %v334_v11 = vld [vmem:[%s795_s3 + $0x8] sm:$0xff] (!%p198_p10) }
  0x11   : > { %478 = vmatprep.subr.bf16.mxu0 (!%p198_p10), %v629_v1  ;;  %s231_s30 = scalar_lea.vmem (!%p198_p10), [#allocation2], %s456_s21  ;;  %s742_s11 = scalar_lea.hbm (!%p198_p10), %s796_s4, %s471_s6 }
  0x12   : > { %s356_s5 = sshll.u32 (!%p198_p10), %s231_s30, 4  ;;  %s744_s5 = int_to_ptr.vmem [resolvable:$true] %s356_s5 }
  0x13   : > { %s549_s12 = scalar_lea.vmem (!%p198_p10), %s744_s5, 256 }
  0x14   : > { %479 = vmatpush3.bf16.msra.mxu0 (!%p198_p10), %v546_v2  ;;  %p550_p12 = scmp.ne.s32.totalorder (!%p198_p10), %s744_s5, %s549_s12 }
  0x15   : > { %480 = vmatprep.subr.bf16.mxu0 (!%p198_p10), %v629_v1 }
  0x16   : > { %s234_s7 = scalar_select %p233_p11, %s619_s18, 1 }
  0x17   : > { %s746_s18 = scalar_lea.sflag [#allocation3], %s229_s14  ;;  %p551_p13 = pnand %p550_p12, %p699_p4 }
  0x18   : > { %s470_s10 = sshll.u32 %s234_s7, 3  ;;  %481 = vmatpush3.bf16.msra.mxu0 %v547_v3 }
  0x19   : > { %s240_s13 = scalar_lea.vmem %s792_s0, %s470_s10  ;;  %p552_p0 = pneg %p551_p13 }
  0x1a   : > { %v548_v4 = vld [vmem:[%s240_s13] sm:$0xff]   ;;  %s631_s13 = smov [#allocation2]  }
  0x1b   : > { %483 = vmatmul.mubr.msk.bf16.vlgmr.msra.gmra.mrb[0].mxu0 %vm288_vm1, %v548_v4  ;;  %s553_s21 = sshll.u32 %s631_s13, 4  ;;  %s554_s21 = int_to_ptr.vmem [resolvable:$false] %s553_s21 }
  0x1c   : > { %s555_s22 = scalar_lea.vmem %s554_s21, 512  ;;  %p556_p1 = scmp.lt.s32.totalorder %s744_s5, %s554_s21 }
  0x1d   : > { %p557_p2 = scmp.lt.s32.totalorder %s555_s22, %s549_s12 }
  0x1f   : > { %p558_p3 = por %p557_p2, %p556_p1 }
  0x21   : > { %p559_p5 = pnand %p558_p3, %p552_p0 }
  0xee   : > { %v326_v6 = vpop.f32.mrb[0].mxu0 }
  0xef   : > { %v327_v8 = vadd.f32 %v459_v5, %v326_v6  ;;  %v484_v9 = vpop.f32.mrb[1].mxu0 }
  0xf0   : > { %v329_v10 = vpop.f32.mrb[2].mxu0 }
  0xf1   : > { %v335_v12 = vadd.f32 %v333_v7, %v327_v8  ;;  %v330_v13 = vadd.f32 %v459_v5, %v329_v10  ;;  %v485_v14 = vpop.f32.mrb[3].mxu0 }
  0xf3   : > { %338 = vst.msk [vmem:[%s231_s30] sm:$0xff] %vm337_vm2, %v335_v12  ;;  %v336_v15 = vadd.f32 %v334_v11, %v330_v13 }
  0xf5   : > { %339 = vst.msk [vmem:[%s231_s30 + $0x8] sm:$0xff] %vm337_vm2, %v336_v15 }
  0xf6   : > { %562 = shalt.err (!%p559_p5)
}
  0xf7   : > { %s563_s14 = scalar_lea.hbm %s742_s11, 256  ;;  %s567_s29 = scalar_lea.hbm %s796_s4, 512 }
  0xf8   : > { %p564_p6 = scmp.ne.s32.totalorder %s742_s11, %s563_s14  ;;  %p568_p10 = scmp.lt.u32.totalorder %s742_s11, %s796_s4 }
  0xf9   : > { %p569_p11 = scmp.lt.u32.totalorder %s567_s29, %s563_s14  ;;  %p571_p13 = scmp.lt.u32.totalorder %s563_s14, %s742_s11 }
  0xfa   : > { %p565_p7 = pnand %p564_p6, %p699_p4 }
  0xfb   : > { %p570_p12 = por %p569_p11, %p568_p10 }
  0xfc   : > { %p566_p9 = pneg %p565_p7 }
  0xfd   : > { %p572_p0 = por %p571_p13, %p570_p12 }
  0xff   : > { %p573_p1 = pnand %p572_p0, %p566_p9 }
 0x101   : > { %576 = shalt.err (!%p573_p1)
}
 0x102   : > { %s632_s7 = smov 128   ;;  %s633_s8 = smov 8  }
 0x103   : > { %486 = dma.vmem_to_hbm [thread:$0]  (%p699_p4), %s744_s5, 256, %s742_s11, %s746_s18, %s632_s7, %s632_s7, %s633_s8  }
 0x104 PF: > { %p492_p2 = scmp.ge.s32.totalorder %s627_s20, 2  ;;  %s371_s9 = sand.u32 1, %s607_s15  }
 0x105   : > { %s372_s10 = scalar_lea.sflag [#allocation3], %s371_s9 }
 0x106   : > { %p489_p3 = pnand %p492_p2, %p706_p8 }
 0x108   : > { %602 = dma.done.wait (!%p489_p3), %s372_s10, 256  }
 0x109   : > { %604 = vsyncadd (!%p489_p3), %s372_s10, 4294967040  ;;  %s17_s20 = sadd.s32 1, %s627_s20   ;;  %s799_s15 = smov %s611_s16 }
 0x10a   : > { %p14_p5 = scmp.ge.s32.totalorder %s17_s20, 4   ;;  %s800_s16 = smov %s615_s17 }
 0x10b   : > { %s801_s17 = smov %s712_s28  ;;  %s802_s18 = smov %s623_s19 }
 0x10c   : > { %s803_s19 = smov %s805_s23  ;;  %16 = sbr.rel (!%p14_p5) target bundleno = 4 (0x4), region = 74 }
 0x113   :  { %377 = vsyncpa [#allocation3], 1 }
 0x114   :  { %379 = vsyncpa [#allocation3 + $0x1], 1 }

</bundles_post_ra>
